<compile_context>
chip_gen: v7x
topology: tpu7x:2x2x1
jax: 0.10.0
libtpu: 0.0.40
codegen_flags: <defaults>
</compile_context>

<pallas_src>
import math
import jax
import jax.numpy as jnp
from jax.experimental import pallas as pl
from jax.experimental.pallas import tpu as pltpu

LANE = 128


def _ceil_to(x, m):
    return ((x + m - 1) // m) * m


def _vmem_capacity_bytes():
    try:
        return int(pltpu.get_tpu_info().vmem_capacity_bytes)
    except Exception:
        return 64 * 1024 * 1024        # conservative (v7x-sized) fallback


# --------------------- pass 1: full-width head projection ---------------------

def _proj_heads_kernel(x_ref, w_ref, b_ref, o_ref):
    """One full-lane-width (t, D) x (D, D) matmul + bias, then head-major split."""
    n_head, _, hd = o_ref.shape
    y = jnp.dot(x_ref[...], w_ref[...],
                preferred_element_type=jnp.float32) + b_ref[...]      # (t, D) f32
    for h in range(n_head):    # static; one lane slice per head, once per tile
        o_ref[h] = y[:, h * hd:(h + 1) * hd].astype(o_ref.dtype)


def _project_heads(x, w, b, n_head, *, block, vmem_cap):
    B, T, D = x.shape
    hd = D // n_head
    t = min(block, T)
    assert T % t == 0, f"sequence length {T} not divisible by tile {t}"

    hd_p = _ceil_to(hd, LANE)
    est = (2 * t * D * 2 + 2 * D * D * 2 + 2 * 8 * D * 4
           + 2 * n_head * t * hd_p * 2 + 2 * t * D * 4)
    cap = (96 if vmem_cap >= 100 * 1024 * 1024 else 40) * 1024 * 1024
    vmem_limit = int(min(cap, max(32 * 1024 * 1024, est * 3 // 2)))

    return pl.pallas_call(
        _proj_heads_kernel,
        out_shape=jax.ShapeDtypeStruct((B, n_head, T, hd), jnp.bfloat16),
        grid_spec=pltpu.PrefetchScalarGridSpec(
            num_scalar_prefetch=0,
            grid=(B, T // t),
            in_specs=[
                pl.BlockSpec((pl.Squeezed(), t, D), lambda b, ti: (b, ti, 0)),
                pl.BlockSpec((D, D), lambda b, ti: (0, 0)),
                pl.BlockSpec((1, D), lambda b, ti: (0, 0)),
            ],
            out_specs=pl.BlockSpec((pl.Squeezed(), n_head, t, hd),
                                   lambda b, ti: (b, 0, ti, 0)),
        ),
        compiler_params=pltpu.CompilerParams(
            dimension_semantics=("parallel", "parallel"),
            vmem_limit_bytes=vmem_limit),
    )(x.astype(jnp.bfloat16), w, b)


# --------------------- pass 2: flash attention + out-proj ---------------------

def _bdot(a, b, ca, cb):
    """Batched (leading batch axis) matmul on the MXU with f32 accumulation."""
    return jax.lax.dot_general(
        a, b, dimension_numbers=(((ca,), (cb,)), ((0,), (0,))),
        preferred_element_type=jnp.float32)


def _mha_flash_kernel(vlen_ref, qh_ref, kh_ref, vh_ref, bias_ref, wo_ref, bo_ref,
                      o_ref, m_sc, l_sc, acc_sc):
    b = pl.program_id(0)
    ki = pl.program_id(2)
    n_kv = pl.num_programs(2)
    n_head = acc_sc.shape[0]
    tk = kh_ref.shape[1]

    @pl.when(ki == 0)
    def _init():
        m_sc[...] = jnp.full(m_sc.shape, -jnp.inf, dtype=m_sc.dtype)
        l_sc[...] = jnp.zeros(l_sc.shape, dtype=l_sc.dtype)
        acc_sc[...] = jnp.zeros(acc_sc.shape, dtype=acc_sc.dtype)

    # Skip kv tiles lying entirely in the padded (masked) key suffix.  Tile 0
    # always runs so l > 0 at finalize (fully-masked rows then reduce to the
    # same uniform-over-masked behavior as masked_fill in the reference).
    @pl.when((ki == 0) | (ki * tk < vlen_ref[b]))
    def _compute():
        qh = qh_ref[...]                               # (H, tq, hd) bf16 (pre-scaled)
        kh = kh_ref[...]                               # (H, tk, hd) bf16
        vh = vh_ref[...]                               # (H, tk, hd) bf16
        s = _bdot(qh, kh, 2, 2)                        # (H, tq, tk) f32
        s = s + bias_ref[...]                          # additive 0 / -1e9 key mask

        m_prev = m_sc[...]                             # (H, tq, 1)
        m_new = jnp.maximum(m_prev, jnp.max(s, axis=-1, keepdims=True))
        alpha = jnp.exp(m_prev - m_new)
        p = jnp.exp(s - m_new)                         # (H, tq, tk) f32
        l_sc[...] = alpha * l_sc[...] + jnp.sum(p, axis=-1, keepdims=True)
        acc_sc[...] = alpha * acc_sc[...] + _bdot(p.astype(jnp.bfloat16), vh, 2, 1)
        m_sc[...] = m_new

    @pl.when(ki == n_kv - 1)
    def _finalize():
        ctx = acc_sc[...] * pl.reciprocal(l_sc[...], approx=True)      # (H, tq, hd)
        # heads -> lanes (torch feature order f = h*hd + c), then ONE full-width
        # (tq, D) x (D, D) output projection (contraction K = D).
        ctx_flat = jnp.concatenate([ctx[h] for h in range(n_head)], axis=-1)
        out = jnp.dot(ctx_flat.astype(jnp.bfloat16), wo_ref[...],
                      preferred_element_type=jnp.float32) + bo_ref[...]
        o_ref[...] = out.astype(o_ref.dtype)


# ------------------------------- wrappers -------------------------------------

def prepare_mha_params(w, n_head):
    """One-time parameter transform (NOT per-call): fold 1/sqrt(head_dim) into
    w_q / b_q, cast matmul operands to bf16 (biases stay f32)."""
    D = w['wq'].shape[0]
    assert D % n_head == 0
    hd = D // n_head
    scale = 1.0 / math.sqrt(hd)
    return dict(
        wq=(w['wq'] * scale).astype(jnp.bfloat16),
        bq=(w['bq'] * scale).reshape(1, D).astype(jnp.float32),
        wk=w['wk'].astype(jnp.bfloat16),
        bk=w['bk'].reshape(1, D).astype(jnp.float32),
        wv=w['wv'].astype(jnp.bfloat16),
        bv=w['bv'].reshape(1, D).astype(jnp.float32),
        wo=w['wo'].astype(jnp.bfloat16),
        bo=w['bo'].reshape(1, D).astype(jnp.float32),
    )


def mha_forward(q, k, v, key_padding_mask, prep, n_head, *, q_block=None, kv_block=None):
    B, Tq, D = q.shape
    Tk = k.shape[1]
    assert D % n_head == 0
    hd = D // n_head

    # ---- per-generation tiling / VMEM budget (64 MiB v7x vs 128 MiB v5e/v6e) ----
    vmem_cap = _vmem_capacity_bytes()
    big_vmem = vmem_cap >= 100 * 1024 * 1024
    if q_block is None:
        q_block = 128
    if kv_block is None:
        kv_block = 512 if big_vmem else 256
    tq = min(q_block, Tq)
    tk = min(kv_block, Tk)
    assert Tq % tq == 0 and Tk % tk == 0

    # ---- pass 1: projections (full-width matmuls, head-major bf16 in HBM) ----
    proj_block = 512 if big_vmem else 256
    qh = _project_heads(q, prep['wq'], prep['bq'], n_head,
                        block=min(proj_block, Tq), vmem_cap=vmem_cap)
    kh = _project_heads(k, prep['wk'], prep['bk'], n_head,
                        block=min(proj_block, Tk), vmem_cap=vmem_cap)
    vh = _project_heads(v, prep['wv'], prep['bv'], n_head,
                        block=min(proj_block, Tk), vmem_cap=vmem_cap)

    # ---- mask: additive bias + per-batch valid key length (tile skipping) ----
    # TODO(synk): only (B, Tk) key-padding masks are supported; general
    # (B, H, Tq, Tk) masks (e.g. causal) would need a mask BlockSpec per kv tile.
    mask = key_padding_mask
    bias = jnp.where(mask, jnp.float32(-1e9), jnp.float32(0.0)).reshape(B, 1, Tk)
    unmasked = jnp.logical_not(mask)
    last = Tk - 1 - jnp.argmax(unmasked[:, ::-1].astype(jnp.int32), axis=1)
    vlen = jnp.where(jnp.any(unmasked, axis=1), last + 1, 0).astype(jnp.int32)

    # ---- per-block VMEM working-set estimate (lane-padded), per-gen cap ----
    hd_p = _ceil_to(hd, LANE)
    est = (2 * n_head * tq * hd_p * 2              # qh tile (bf16, double-buffered)
           + 2 * 2 * n_head * tk * hd_p * 2        # kh + vh tiles
           + 2 * 8 * tk * 4                        # bias tile
           + 2 * D * D * 2 + 2 * 8 * D * 4         # resident wo + bo
           + 2 * tq * D * 4                        # output tile
           + 2 * n_head * tq * LANE * 4            # m, l scratch (lane-padded)
           + n_head * tq * hd_p * 4                # acc scratch
           + 4 * n_head * tq * tk * 4)             # s / p temporaries
    cap = (96 if big_vmem else 40) * 1024 * 1024
    vmem_limit = int(min(cap, max(32 * 1024 * 1024, est * 3 // 2)))

    # B * (Tq // tq) "parallel" steps shard across v7x's 2 TensorCores.
    grid = (B, Tq // tq, Tk // tk)

    # TODO(synk): on v7x with large D, single-buffer the resident wo/bo blocks
    # (pipeline_mode=pl.Buffered(1)) to halve their VMEM footprint.
    return pl.pallas_call(
        _mha_flash_kernel,
        out_shape=jax.ShapeDtypeStruct((B, Tq, D), q.dtype),
        grid_spec=pltpu.PrefetchScalarGridSpec(
            num_scalar_prefetch=1,                 # per-batch valid key length -> SMEM
            grid=grid,
            in_specs=[
                pl.BlockSpec((pl.Squeezed(), n_head, tq, hd),
                             lambda b, qi, ki, vl: (b, 0, qi, 0)),       # qh
                pl.BlockSpec((pl.Squeezed(), n_head, tk, hd),
                             lambda b, qi, ki, vl: (b, 0, ki, 0)),       # kh
                pl.BlockSpec((pl.Squeezed(), n_head, tk, hd),
                             lambda b, qi, ki, vl: (b, 0, ki, 0)),       # vh
                pl.BlockSpec((pl.Squeezed(), 1, tk),
                             lambda b, qi, ki, vl: (b, 0, ki)),          # mask bias
                pl.BlockSpec((D, D), lambda b, qi, ki, vl: (0, 0)),      # wo
                pl.BlockSpec((1, D), lambda b, qi, ki, vl: (0, 0)),      # bo
            ],
            out_specs=pl.BlockSpec((pl.Squeezed(), tq, D),
                                   lambda b, qi, ki, vl: (b, qi, 0)),
            scratch_shapes=[
                # m/l kept (H, tq, 1): sublane-major matches the score layout so the
                # per-step broadcast is a free lane-broadcast; the ~0.5 MiB of lane
                # padding is irrelevant even under v7x's 64 MiB budget.
                pltpu.VMEM((n_head, tq, 1), jnp.float32),     # running max m
                pltpu.VMEM((n_head, tq, 1), jnp.float32),     # running sum l
                pltpu.VMEM((n_head, tq, hd), jnp.float32),    # unnormalized context
            ]),
        compiler_params=pltpu.CompilerParams(
            dimension_semantics=("parallel", "parallel", "arbitrary"),
            vmem_limit_bytes=vmem_limit),
    )(vlen, qh, kh, vh, bias, prep['wo'], prep['bo'])


# -------------------------- pure-JAX reference --------------------------------

def ref_mha(q, k, v, key_padding_mask, w, n_head):
    """Follows the PyTorch module exactly (f32): masked_fill_(-1e9) first,
    then divide by sqrt(head_dim), then softmax."""
    B, Tq, D = q.shape
    Tk = k.shape[1]
    hd = D // n_head
    Q = (q @ w['wq'] + w['bq']).reshape(B, Tq, n_head, hd).transpose(0, 2, 1, 3)
    K = (k @ w['wk'] + w['bk']).reshape(B, Tk, n_head, hd).transpose(0, 2, 1, 3)
    V = (v @ w['wv'] + w['bv']).reshape(B, Tk, n_head, hd).transpose(0, 2, 1, 3)
    s = jnp.einsum('bhqd,bhkd->bhqk', Q, K)
    s = jnp.where(key_padding_mask[:, None, None, :], -1e9, s)
    a = jax.nn.softmax(s / (hd ** 0.5), axis=-1)
    ctx = jnp.einsum('bhqk,bhkd->bhqd', a, V).transpose(0, 2, 1, 3).reshape(B, Tq, D)
    return ctx @ w['wo'] + w['bo']


# ------------------------------ init helpers ----------------------------------

def init_mha_params(key, d_model):
    def lin(kk, fan_in, fan_out):
        kw, kb = jax.random.split(kk)
        bound = 1.0 / math.sqrt(fan_in)
        return (jax.random.uniform(kw, (fan_in, fan_out), jnp.float32, -bound, bound),
                jax.random.uniform(kb, (fan_out,), jnp.float32, -bound, bound))
    ks = jax.random.split(key, 4)
    wq, bq = lin(ks[0], d_model, d_model)
    wk, bk = lin(ks[1], d_model, d_model)
    wv, bv = lin(ks[2], d_model, d_model)
    wo, bo = lin(ks[3], d_model, d_model)
    return dict(wq=wq, bq=bq, wk=wk, bk=bk, wv=wv, bv=bv, wo=wo, bo=bo)


# ----------------------------------- main --------------------------------------

if __name__ == "__main__":
    d_model, n_head = 128, 4
    B, Tq, Tk = 2, 128, 256

    key = jax.random.PRNGKey(0)
    kq, kk_, kv_, kw, _ = jax.random.split(key, 5)
    q = jax.random.normal(kq, (B, Tq, d_model), jnp.float32)
    k = jax.random.normal(kk_, (B, Tk, d_model), jnp.float32)
    v = jax.random.normal(kv_, (B, Tk, d_model), jnp.float32)

    # key-padding mask: True = masked.  b=1 masks keys >= 100 so that with
    # kv_block=128 its second kv tile is fully padded and exercises the skip.
    key_mask = (jnp.zeros((B, Tk), dtype=bool)
                .at[0, -17:].set(True)
                .at[1, 100:].set(True))

    params = init_mha_params(kw, d_model)
    prep = prepare_mha_params(params, n_head)     # one-time parameter transform

    # kv_block=128 forces >= 2 kv tiles so the online-softmax carry and the
    # padded-tile skip are both exercised; production uses per-gen defaults.
    out = mha_forward(q, k, v, key_mask, prep, n_head, kv_block=128)
    out = jax.block_until_ready(out)

    ref = ref_mha(q, k, v, key_mask, params, n_head)
    ref = jax.block_until_ready(ref)

    max_err = float(jnp.max(jnp.abs(out - ref)))
    assert out.shape == (B, Tq, d_model)
    # bf16 MXU operands + approx reciprocal vs f32 reference
    assert max_err < 5e-2, f"mismatch vs reference: max abs err {max_err}"
    print("KERNEL_OK")
</pallas_src>

<mosaic_0001>
module attributes {stable_mosaic.version = 11 : i64} {
  func.func @_proj_heads_kernel(%arg0: i32, %arg1: i32, %arg2: memref<1x128x128xbf16, #tpu.memory_space<vmem>>, %arg3: memref<128x128xbf16, #tpu.memory_space<vmem>>, %arg4: memref<1x128xf32, #tpu.memory_space<vmem>>, %arg5: memref<1x4x128x32xbf16, #tpu.memory_space<vmem>>) attributes {dimension_semantics = [#tpu.dimension_semantics<parallel>, #tpu.dimension_semantics<parallel>], iteration_bounds = array<i64: 2, 1>, scalar_prefetch = 0 : i64, scratch_operands = 0 : i64, tpu.core_type = #tpu.core_type<tc>, window_params = [{transform_indices = @transform_0, window_bounds = array<i64: 1, 128, 128>}, {pipeline_mode = #tpu.pipeline_mode<synchronous>, transform_indices = @transform_1, window_bounds = array<i64: 128, 128>}, {pipeline_mode = #tpu.pipeline_mode<synchronous>, transform_indices = @transform_2, window_bounds = array<i64: 1, 128>}, {transform_indices = @transform_3, window_bounds = array<i64: 1, 4, 128, 32>}]} {
    %c0 = arith.constant 0 : index
    %c0_0 = arith.constant 0 : index
    %c0_1 = arith.constant 0 : index
    %0 = vector.load %arg2[%c0, %c0_0, %c0_1] : memref<1x128x128xbf16, #tpu.memory_space<vmem>>, vector<1x128x128xbf16>
    %1 = vector.shape_cast %0 : vector<1x128x128xbf16> to vector<128x128xbf16>
    %c0_2 = arith.constant 0 : index
    %c0_3 = arith.constant 0 : index
    %2 = vector.load %arg3[%c0_2, %c0_3] : memref<128x128xbf16, #tpu.memory_space<vmem>>, vector<128x128xbf16>
    %cst = arith.constant dense<0.000000e+00> : vector<128x128xf32>
    %3 = tpu.matmul %1, %2, %cst {dimension_numbers = #tpu.dot_dimension_numbers<[1], [0], [0], [1], [0, 0, 1, 1], [], []>} : vector<128x128xbf16>, vector<128x128xbf16>, vector<128x128xf32> -> vector<128x128xf32>
    %c0_4 = arith.constant 0 : index
    %c0_5 = arith.constant 0 : index
    %4 = vector.load %arg4[%c0_4, %c0_5] : memref<1x128xf32, #tpu.memory_space<vmem>>, vector<1x128xf32>
    %5 = vector.broadcast %4 : vector<1x128xf32> to vector<128x128xf32>
    %6 = arith.addf %3, %5 : vector<128x128xf32>
    %7 = vector.extract_strided_slice %6 {offsets = [0, 0], sizes = [128, 32], strides = [1, 1]} : vector<128x128xf32> to vector<128x32xf32>
    %8 = arith.truncf %7 : vector<128x32xf32> to vector<128x32xbf16>
    %c0_6 = arith.constant 0 : index
    %c0_7 = arith.constant 0 : index
    %c0_8 = arith.constant 0 : index
    %c0_9 = arith.constant 0 : index
    %9 = vector.load %arg5[%c0_6, %c0_7, %c0_8, %c0_9] : memref<1x4x128x32xbf16, #tpu.memory_space<vmem>>, vector<1x1x128x32xbf16>
    %10 = vector.shape_cast %9 : vector<1x1x128x32xbf16> to vector<128x32xbf16>
    %11 = vector.shape_cast %8 : vector<128x32xbf16> to vector<1x1x128x32xbf16>
    tpu.vector_store %arg5[%c0_6, %c0_7, %c0_8, %c0_9], %11 {strides = array<i32>} : memref<1x4x128x32xbf16, #tpu.memory_space<vmem>>, vector<1x1x128x32xbf16>,
    %12 = vector.extract_strided_slice %6 {offsets = [0, 32], sizes = [128, 32], strides = [1, 1]} : vector<128x128xf32> to vector<128x32xf32>
    %13 = arith.truncf %12 : vector<128x32xf32> to vector<128x32xbf16>
    %c0_10 = arith.constant 0 : index
    %c1 = arith.constant 1 : index
    %c0_11 = arith.constant 0 : index
    %c0_12 = arith.constant 0 : index
    %14 = vector.load %arg5[%c0_10, %c1, %c0_11, %c0_12] : memref<1x4x128x32xbf16, #tpu.memory_space<vmem>>, vector<1x1x128x32xbf16>
    %15 = vector.shape_cast %14 : vector<1x1x128x32xbf16> to vector<128x32xbf16>
    %16 = vector.shape_cast %13 : vector<128x32xbf16> to vector<1x1x128x32xbf16>
    tpu.vector_store %arg5[%c0_10, %c1, %c0_11, %c0_12], %16 {strides = array<i32>} : memref<1x4x128x32xbf16, #tpu.memory_space<vmem>>, vector<1x1x128x32xbf16>,
    %17 = vector.extract_strided_slice %6 {offsets = [0, 64], sizes = [128, 32], strides = [1, 1]} : vector<128x128xf32> to vector<128x32xf32>
    %18 = arith.truncf %17 : vector<128x32xf32> to vector<128x32xbf16>
    %c0_13 = arith.constant 0 : index
    %c2 = arith.constant 2 : index
    %c0_14 = arith.constant 0 : index
    %c0_15 = arith.constant 0 : index
    %19 = vector.load %arg5[%c0_13, %c2, %c0_14, %c0_15] : memref<1x4x128x32xbf16, #tpu.memory_space<vmem>>, vector<1x1x128x32xbf16>
    %20 = vector.shape_cast %19 : vector<1x1x128x32xbf16> to vector<128x32xbf16>
    %21 = vector.shape_cast %18 : vector<128x32xbf16> to vector<1x1x128x32xbf16>
    tpu.vector_store %arg5[%c0_13, %c2, %c0_14, %c0_15], %21 {strides = array<i32>} : memref<1x4x128x32xbf16, #tpu.memory_space<vmem>>, vector<1x1x128x32xbf16>,
    %22 = vector.extract_strided_slice %6 {offsets = [0, 96], sizes = [128, 32], strides = [1, 1]} : vector<128x128xf32> to vector<128x32xf32>
    %23 = arith.truncf %22 : vector<128x32xf32> to vector<128x32xbf16>
    %c0_16 = arith.constant 0 : index
    %c3 = arith.constant 3 : index
    %c0_17 = arith.constant 0 : index
    %c0_18 = arith.constant 0 : index
    %24 = vector.load %arg5[%c0_16, %c3, %c0_17, %c0_18] : memref<1x4x128x32xbf16, #tpu.memory_space<vmem>>, vector<1x1x128x32xbf16>
    %25 = vector.shape_cast %24 : vector<1x1x128x32xbf16> to vector<128x32xbf16>
    %26 = vector.shape_cast %23 : vector<128x32xbf16> to vector<1x1x128x32xbf16>
    tpu.vector_store %arg5[%c0_16, %c3, %c0_17, %c0_18], %26 {strides = array<i32>} : memref<1x4x128x32xbf16, #tpu.memory_space<vmem>>, vector<1x1x128x32xbf16>,
    return
  }
  func.func @transform_0(%arg0: i32, %arg1: i32) -> (i32, i32, i32) {
    %c0_i32 = arith.constant 0 : i32
    %c0_i32_0 = arith.constant 0 : i32
    return %arg0, %arg1, %c0_i32 : i32, i32, i32
  }
  func.func @transform_1(%arg0: i32, %arg1: i32) -> (i32, i32) {
    %c0_i32 = arith.constant 0 : i32
    %c0_i32_0 = arith.constant 0 : i32
    %c0_i32_1 = arith.constant 0 : i32
    return %c0_i32, %c0_i32_0 : i32, i32
  }
  func.func @transform_2(%arg0: i32, %arg1: i32) -> (i32, i32) {
    %c0_i32 = arith.constant 0 : i32
    %c0_i32_0 = arith.constant 0 : i32
    %c0_i32_1 = arith.constant 0 : i32
    return %c0_i32, %c0_i32_0 : i32, i32
  }
  func.func @transform_3(%arg0: i32, %arg1: i32) -> (i32, i32, i32, i32) {
    %c0_i32 = arith.constant 0 : i32
    %c0_i32_0 = arith.constant 0 : i32
    %c0_i32_1 = arith.constant 0 : i32
    return %arg0, %c0_i32, %arg1, %c0_i32_0 : i32, i32, i32, i32
  }
}

</mosaic_0001>

<bundles_post_ra>
// kernel: tpu_custom_call.1
= control target key start
LH: loop header
LB: loop body
LE: loop exit
PB: predicated region body
PF: predicated region fallthrough
CT: control target
= control target key end

     0   :  { %8 = vsyncpa [#allocation3], 0  ;;  %s1627_s0 = inlined_call_operand.hbm [shape: bf16[2,128,128], index: 0, kind: input, shape index: {}]   ;;  %s1628_s1 = inlined_call_operand.hbm [shape: bf16[128,128], index: 1, kind: input, shape index: {}]   ;;  %s1629_s2 = inlined_call_operand.vmem [shape: f32[1,128], index: 2, kind: input, shape index: {}]   ;;  %s1630_s3 = inlined_call_operand.vmem [shape: bf16[2,4,128,32], index: 3, kind: output, shape index: {}]  }
   0x1   :  { %10 = vsyncpa [#allocation3 + $0x1], 0 }
   0x2   :  { %11 = vsyncpa [#allocation5], 0  ;;  %s1254_s12 = smov 0   ;;  %s1256_s13 = smov 0  }
   0x3   :  { %s1258_s14 = smov 0   ;;  %s1260_s15 = smov 0  }
   0x4   :  { %s1262_s16 = smov 0   ;;  %s1264_s17 = smov 0  }
   0x5 LB: > { %s848_s18 = sadd.s32 4294967295, %s1225_s17   ;;  %p51_p0 = scmp.ne.s32.totalorder %s1209_s13, %s1205_s12  ;;  %s1225_s17 = sphi %s1264_s17, %s17_s17   ;;  %s1221_s16 = sphi %s1262_s16, %s1647_s16   ;;  %s1217_s15 = sphi %s1260_s15, %s1646_s15   ;;  %s1213_s14 = sphi %s1258_s14, %s1645_s14   ;;  %s1209_s13 = sphi %s1256_s13, %s1644_s13   ;;  %s1205_s12 = sphi %s1254_s12, %s1643_s12  }
   0x6   : > { %p1284_p1 = scmp.eq.s32.totalorder %s848_s18, 0  ;;  %p850_p2 = scmp.ge.s32.totalorder %s1225_s17, 1 }
   0x7   : > { %p132_p3 = scmp.lt.s32.totalorder %s1225_s17, 3  ;;  %s1227_s22 = smov [#allocation4]  }
   0x8   : > { %s1635_s19 = scalar_select %p1284_p1, 1, 0 }
   0x9   : > { %p1292_p4 = por %p1284_p1, %p51_p0  ;;  %p1296_p5 = pnand %p850_p2, %p132_p3 }
   0xa   : > { %s144_s23 = sshll.u32 %s1227_s22, 4  ;;  %s29_s25 = sadd.s32 1, %s1221_s16  ;;  %s145_s23 = int_to_ptr.vmem [resolvable:$true] %s144_s23 }
   0xb   : > { %s1636_s20 = scalar_select %p1292_p4, 1, 0 }
   0xc   : > { %s1637_s21 = scalar_select %p1296_p5, 1, 0 }
   0xd   : > { %p1032_p6 = pneg %p1296_p5  ;;  %s1113_s28 = scalar_lea.hbm %s1628_s1, 1024 }
   0xe   : > { %p1114_p8 = scmp.ne.s32.totalorder %s1628_s1, %s1113_s28  ;;  %p1120_p12 = scmp.lt.u32.totalorder %s1113_s28, %s1628_s1 }
   0xf   : > { %p1304_p7 = pnand %p1032_p6, %p1284_p1 }
  0x11   : > { %p1115_p9 = pneg %p1304_p7 }
  0x13   : > { %p1116_p10 = pnand %p1115_p9, %p1114_p8 }
  0x15   : > { %p1117_p11 = pneg %p1116_p10 }
  0x17   : > { %p1122_p13 = pnand %p1120_p12, %p1117_p11 }
  0x19   : > { %1125 = shalt.err (!%p1122_p13)
}
  0x1a   : > { %s1126_s6 = scalar_lea.vmem %s145_s23, 1024  ;;  %p1134_p6 = scmp.lt.s32.totalorder %s145_s23, %s145_s23 }
  0x1b   : > { %p1127_p0 = scmp.ne.s32.totalorder %s145_s23, %s1126_s6  ;;  %p1135_p1 = scmp.lt.s32.totalorder %s1126_s6, %s1126_s6 }
  0x1d   : > { %p1129_p2 = pnand %p1127_p0, %p1115_p9  ;;  %p1136_p4 = por %p1135_p1, %p1134_p6 }
  0x1f   : > { %p1130_p3 = pneg %p1129_p2 }
  0x21   : > { %p1137_p5 = pnand %p1136_p4, %p1130_p3 }
  0x23   : > { %1140 = shalt.err (!%p1137_p5)
}
  0x24   : > { %s1228_s7 = smov 64   ;;  %s1229_s8 = smov 4  }
  0x25   : > { %1035 = dma.hbm_to_vmem [thread:$0]  (!%p1304_p7), %s1628_s1, 1024, %s145_s23, [#allocation5], %s1228_s7, %s1228_s7, %s1229_s8  }
  0x26   : > { %p31_p1 = scmp.ge.s32.totalorder %s29_s25, 2  ;;  %s38_s11 = sadd.s32 1, %s1213_s14 }
  0x27   : > { %p45_p4 = scmp.ne.s32.totalorder %s1213_s14, %s1209_s13  ;;  %p46_p5 = scmp.eq.s32.totalorder %s1225_s17, 0 }
  0x28   : > { %s1649_s25 = smov (%p31_p1, %s29_s25), 0  ;;  %p1041_p9 = scmp.lt.s32.totalorder %s1225_s17, 2 }
  0x29   : > { %p47_p8 = por %p46_p5, %p45_p4  ;;  %s33_s12 = ssub.s32 %s1221_s16, %s1649_s25 }
  0x2a   : > { %s161_s18 = sand.u32 1, %s1213_s14   ;;  %p36_p10 = scmp.eq.s32.totalorder %s33_s12, 0 }
  0x2b   : > { %s853_s22 = sshll.u32 %s161_s18, 6  ;;  %s944_s24 = sshll.u32 %s1221_s16, 10 }
  0x2c   : > { %s1340_s26 = scalar_select %p36_p10, %s1213_s14, %s38_s11  }
  0x2d   : > { %s1345_s23 = scalar_lea.hbm %s1627_s0, %s944_s24  ;;  %s165_s29 = scalar_lea.vmem [#allocation2], %s853_s22 }
  0x2e   : > { %s174_s30 = sshll.u32 %s165_s29, 4  ;;  %p1347_p7 = pnand %p1041_p9, %p47_p8  ;;  %s1351_s30 = int_to_ptr.vmem [resolvable:$true] %s174_s30 }
  0x2f   : > { %s1353_s5 = scalar_lea.sflag [#allocation3], %s161_s18  ;;  %s1141_s6 = scalar_lea.hbm %s1345_s23, 1024 }
  0x30   : > { %p1142_p11 = scmp.ne.s32.totalorder %s1345_s23, %s1141_s6  ;;  %p1143_p12 = pneg %p1347_p7 }
  0x31   : > { %s1146_s11 = scalar_lea.hbm %s1627_s0, 2048  ;;  %p1147_p2 = scmp.lt.u32.totalorder %s1345_s23, %s1627_s0 }
  0x32   : > { %p1144_p13 = pnand %p1143_p12, %p1142_p11  ;;  %p1148_p3 = scmp.lt.u32.totalorder %s1146_s11, %s1141_s6 }
  0x33   : > { %p1150_p1 = scmp.lt.u32.totalorder %s1141_s6, %s1345_s23 }
  0x34   : > { %p1145_p0 = pneg %p1144_p13  ;;  %p1149_p6 = por %p1148_p3, %p1147_p2 }
  0x36   : > { %p1151_p4 = por %p1150_p1, %p1149_p6 }
  0x38   : > { %p1152_p5 = pnand %p1151_p4, %p1145_p0 }
  0x3a   : > { %1155 = shalt.err (!%p1152_p5)
}
  0x3b   : > { %s1156_s18 = scalar_lea.vmem %s1351_s30, 1024  ;;  %s1230_s24 = smov [#allocation2]  }
  0x3c   : > { %p1157_p8 = scmp.ne.s32.totalorder %s1351_s30, %s1156_s18  ;;  %s1161_s27 = sshll.u32 %s1230_s24, 4  ;;  %s1162_s27 = int_to_ptr.vmem [resolvable:$false] %s1161_s27 }
  0x3d   : > { %s1163_s28 = scalar_lea.vmem %s1162_s27, 2048  ;;  %p1164_p11 = scmp.lt.s32.totalorder %s1351_s30, %s1162_s27 }
  0x3e   : > { %p1159_p9 = pnand %p1157_p8, %p1143_p12  ;;  %p1165_p13 = scmp.lt.s32.totalorder %s1163_s28, %s1156_s18 }
  0x40   : > { %p1160_p10 = pneg %p1159_p9  ;;  %p1166_p2 = por %p1165_p13, %p1164_p11 }
  0x42   : > { %p1167_p3 = pnand %p1166_p2, %p1160_p10 }
  0x44   : > { %1170 = shalt.err (!%p1167_p3)
}
  0x45   : > { %1039 = dma.hbm_to_vmem [thread:$0]  (!%p1347_p7), %s1345_s23, 1024, %s1351_s30, %s1353_s5, %s1228_s7, %s1228_s7, %s1229_s8  }
  0x46   : > { %p1640_p12 = scmp.ne.s32.totalorder %s1637_s21, 0 }
  0x47   : > { %s188_s29 = sand.u32 (!%p1640_p12), 1, %s1209_s13   ;;  %p1641_p0 = scmp.ne.s32.totalorder (!%p1640_p12), %s1636_s20, 0 }
  0x48   : > { %186 = sbr.rel (%p1640_p12) target bundleno = 540 (0x21c), region = 32  ;;  %s857_s6 = sshll.u32 (!%p1640_p12), %s188_s29, 6 }
  0x49   : > { %s189_s9 = scalar_lea.sflag (!%p1640_p12), [#allocation3], %s188_s29  ;;  %s1387_s10 = scalar_lea.vmem (!%p1640_p12), [#allocation2], %s857_s6 }
  0x4f   : > { %1196 = dma.done.wait (%p1641_p0), %s189_s9, 1024  }
  0x50   : > { %1198 = vsyncadd (%p1641_p0), %s189_s9, 4294966272  ;;  %p1642_p6 = scmp.ne.s32.totalorder %s1635_s19, 0 }
  0x52   : > { %1200 = dma.done.wait (%p1642_p6), [#allocation5], 1024  }
  0x53   : > { %1202 = vsyncadd (%p1642_p6), [#allocation5], 4294966272  ;;  %v1097_v0 = vld [vmem:[#allocation4] sm:$0xff]   ;;  %v1098_v1 = vld [vmem:[#allocation4 + $0x8] sm:$0xff]   ;;  %p225_p7 = scmp.lt.s32.totalorder %s1217_s15, 1  ;;  %vm531_vm0 = vcmask 257024  }
  0x54   : > { %978 = vmatprep.subr.bf16.mxu0 %v1097_v0  ;;  %1010 = vmatprep.subr.bf16.mxu1 %v1097_v0  ;;  %v1099_v2 = vld [vmem:[#allocation4 + $0x10] sm:$0xff]   ;;  %v1100_v3 = vld [vmem:[#allocation4 + $0x18] sm:$0xff]   ;;  %v1105_v4 = vld [vmem:[%s1387_s10] sm:$0xff]   ;;  %s1232_s30 = smov 64   ;;  %s1233_s4 = smov 32  }
  0x55   : > { %979 = vmatpush3.bf16.msra.mxu0 %v1097_v0  ;;  %1018 = vmatpush3.bf16.msra.mxu1 %v1097_v0  ;;  %v1106_v5 = vld [vmem:[%s1387_s10 + $0x20] sm:$0xff]   ;;  %v1102_v7 = vld [vmem:[#allocation4 + $0x28] sm:$0xff]   ;;  %v1103_v8 = vld [vmem:[#allocation4 + $0x30] sm:$0xff]   ;;  %s1651_s15 = smov (!%p225_p7, %s1217_s15), 1 }
  0x56   : > { %980 = vmatprep.subr.bf16.mxu0 %v1098_v1  ;;  %1011 = vmatprep.subr.bf16.mxu1 %v1098_v1  ;;  %v1101_v6 = vld [vmem:[#allocation4 + $0x20] sm:$0xff]   ;;  %v1104_v9 = vld [vmem:[#allocation4 + $0x38] sm:$0xff]   ;;  %v1107_v10 = vld [vmem:[%s1387_s10 + $0x8] sm:$0xff]   ;;  %s945_s21 = sshll.u32 %s1651_s15, 8  ;;  %s1231_s15 = smov 96  }
  0x57   : > { %994 = vmatprep.mubr.bf16.mxu0 %v1105_v4  ;;  %1002 = vmatprep.mubr.bf16.mxu1 %v1106_v5  ;;  %v1108_v11 = vld [vmem:[%s1387_s10 + $0x28] sm:$0xff]   ;;  %v1109_v12 = vld [vmem:[%s1387_s10 + $0x10] sm:$0xff]   ;;  %v1110_v14 = vld [vmem:[%s1387_s10 + $0x18] sm:$0xff]   ;;  %s1413_s23 = scalar_lea.vmem %s1630_s3, %s945_s21 }
  0x58   : > { %v1111_v13 = vld [vmem:[%s1387_s10 + $0x30] sm:$0xff]   ;;  %v1112_v15 = vld [vmem:[%s1387_s10 + $0x38] sm:$0xff]   ;;  %v861_v16 = vld [vmem:[%s1629_s2] ss:$0 sm:$0xff] }
  0x59   : > { %981 = vmatpush3.bf16.msra.mxu0 %v1098_v1  ;;  %1019 = vmatpush3.bf16.msra.mxu1 %v1098_v1 }
  0x5a   : > { %982 = vmatprep.subr.bf16.mxu0 %v1099_v2  ;;  %1012 = vmatprep.subr.bf16.mxu1 %v1099_v2 }
  0x5d   : > { %983 = vmatpush3.bf16.msra.mxu0 %v1099_v2  ;;  %1020 = vmatpush3.bf16.msra.mxu1 %v1099_v2 }
  0x5e   : > { %984 = vmatprep.subr.bf16.mxu0 %v1100_v3  ;;  %1013 = vmatprep.subr.bf16.mxu1 %v1100_v3 }
  0x61   : > { %985 = vmatpush3.bf16.msra.mxu0 %v1100_v3  ;;  %1021 = vmatpush3.bf16.msra.mxu1 %v1100_v3 }
  0x62   : > { %986 = vmatprep.subr.bf16.mxu0 %v1101_v6  ;;  %1014 = vmatprep.subr.bf16.mxu1 %v1101_v6 }
  0x65   : > { %987 = vmatpush3.bf16.msra.mxu0 %v1101_v6  ;;  %1022 = vmatpush3.bf16.msra.mxu1 %v1101_v6 }
  0x66   : > { %988 = vmatprep.subr.bf16.mxu0 %v1102_v7  ;;  %1015 = vmatprep.subr.bf16.mxu1 %v1102_v7 }
  0x69   : > { %989 = vmatpush3.bf16.msra.mxu0 %v1102_v7  ;;  %1023 = vmatpush3.bf16.msra.mxu1 %v1102_v7 }
  0x6a   : > { %990 = vmatprep.subr.bf16.mxu0 %v1103_v8  ;;  %1016 = vmatprep.subr.bf16.mxu1 %v1103_v8 }
  0x6d   : > { %991 = vmatpush3.bf16.msra.mxu0 %v1103_v8  ;;  %1024 = vmatpush3.bf16.msra.mxu1 %v1103_v8 }
  0x6e   : > { %992 = vmatprep.subr.bf16.mxu0 %v1104_v9  ;;  %1017 = vmatprep.subr.bf16.mxu1 %v1104_v9 }
  0x71   : > { %993 = vmatpush3.bf16.msra.mxu0 %v1104_v9  ;;  %1025 = vmatpush3.bf16.msra.mxu1 %v1104_v9 }
  0x74   : > { %995 = vmatmul.mubr.bf16.vlgmr.msra.gmra.mrb[0].mxu0 %v1107_v10  ;;  %1003 = vmatmul.mubr.bf16.vlgmr.msra.gmra.mrb[0].mxu1 %v1108_v11 }
  0x75   : > { %998 = vmatprep.mubr.bf16.mxu0 %v1109_v12  ;;  %1006 = vmatprep.mubr.bf16.mxu1 %v1111_v13 }
  0x7c   : > { %999 = vmatmul.mubr.bf16.gmra.mrb[4].mxu0 %v1110_v14  ;;  %1007 = vmatmul.mubr.bf16.gmra.mrb[4].mxu1 %v1112_v15 }
 0x147   : > { %v996_v17 = vpop.f32.mrb[0].mxu0  ;;  %v1004_v18 = vpop.f32.mrb[0].mxu1 }
 0x148   : > { %v413_v19 = vadd.f32 %v996_v17, %v861_v16  ;;  %v445_v20 = vadd.f32 %v1004_v18, %v861_v16  ;;  %v404_v21 = vpop.f32.mrb[1].mxu0  ;;  %v436_v22 = vpop.f32.mrb[1].mxu1 }
 0x149   : > { %v405_v23 = vadd.f32 %v861_v16, %v404_v21  ;;  %v437_v24 = vadd.f32 %v861_v16, %v436_v22  ;;  %v997_v25 = vpop.f32.mrb[2].mxu0  ;;  %v1005_v26 = vpop.f32.mrb[2].mxu1 }
 0x14a   : > { %v948_v27 = vpack.c.bf16 %v413_v19, %v413_v19  ;;  %v1415_v28 = vpack.c.bf16 %v445_v20, %v445_v20  ;;  %v416_v29 = vadd.f32 %v997_v25, %v861_v16  ;;  %v448_v30 = vadd.f32 %v1005_v26, %v861_v16  ;;  %v407_v31 = vpop.f32.mrb[3].mxu0  ;;  %v439_v32 = vpop.f32.mrb[3].mxu1 }
 0x14b   : > { %v1417_v33 = vpack.c.bf16 %v405_v23, %v405_v23  ;;  %v1419_v34 = vpack.c.bf16 %v437_v24, %v437_v24  ;;  %v408_v35 = vadd.f32 %v861_v16, %v407_v31  ;;  %v440_v36 = vadd.f32 %v861_v16, %v439_v32 }
 0x14c   : > { %534 = vst.msk [vmem:[%s1413_s23 + $0x8] sm:$0xf] %vm531_vm0, %v948_v27  ;;  %542 = vst.msk [vmem:[%s1413_s23 + $0x28] sm:$0xf] %vm531_vm0, %v1415_v28  ;;  %v949_v37 = vpack.c.bf16 %v416_v29, %v416_v29  ;;  %v957_v38 = vpack.c.bf16 %v448_v30, %v448_v30  ;;  %568 = vrot.lane.b32.xlu0 %v1415_v28, %s1231_s15  ;;  %552 = vrot.lane.b32.xlu1 %v948_v27, %s1231_s15 }
 0x14d   : > { %532 = vst.msk [vmem:[%s1413_s23] sm:$0xf] %vm531_vm0, %v1417_v33  ;;  %540 = vst.msk [vmem:[%s1413_s23 + $0x20] sm:$0xf] %vm531_vm0, %v1419_v34  ;;  %v947_v39 = vpack.c.bf16 %v408_v35, %v408_v35  ;;  %v955_v40 = vpack.c.bf16 %v440_v36, %v440_v36 }
 0x14e   : > { %535 = vst.msk [vmem:[%s1413_s23 + $0xc] sm:$0xf] %vm531_vm0, %v949_v37  ;;  %543 = vst.msk [vmem:[%s1413_s23 + $0x2c] sm:$0xf] %vm531_vm0, %v957_v38 }
 0x14f   : > { %533 = vst.msk [vmem:[%s1413_s23 + $0x4] sm:$0xf] %vm531_vm0, %v947_v39  ;;  %541 = vst.msk [vmem:[%s1413_s23 + $0x24] sm:$0xf] %vm531_vm0, %v955_v40  ;;  %v1000_v41 = vpop.f32.mrb[4].mxu0  ;;  %v1008_v42 = vpop.f32.mrb[4].mxu1 }
 0x150   : > { %617 = vrot.lane.b32.xlu0 %v948_v27, %s1232_s30  ;;  %554 = vrot.lane.b32.xlu1 %v949_v37, %s1231_s15  ;;  %v429_v43 = vadd.f32 %v1000_v41, %v861_v16  ;;  %v420_v44 = vpop.f32.mrb[5].mxu0  ;;  %v461_v45 = vadd.f32 %v1008_v42, %v861_v16  ;;  %v452_v46 = vpop.f32.mrb[5].mxu1 }
 0x151   : > { %v421_v47 = vadd.f32 %v861_v16, %v420_v44  ;;  %v1001_v48 = vpop.f32.mrb[6].mxu0  ;;  %v453_v49 = vadd.f32 %v861_v16, %v452_v46  ;;  %v1009_v50 = vpop.f32.mrb[6].mxu1 }
 0x152   : > { %v952_v51 = vpack.c.bf16 %v429_v43, %v429_v43  ;;  %v432_v52 = vadd.f32 %v1001_v48, %v861_v16  ;;  %v423_v53 = vpop.f32.mrb[7].mxu0  ;;  %v960_v54 = vpack.c.bf16 %v461_v45, %v461_v45  ;;  %v464_v55 = vadd.f32 %v1009_v50, %v861_v16  ;;  %v455_v56 = vpop.f32.mrb[7].mxu1 }
 0x153   : > { %v950_v57 = vpack.c.bf16 %v421_v47, %v421_v47  ;;  %v424_v58 = vadd.f32 %v861_v16, %v423_v53  ;;  %v958_v59 = vpack.c.bf16 %v453_v49, %v453_v49  ;;  %v456_v60 = vadd.f32 %v861_v16, %v455_v56 }
 0x154   : > { %633 = vrot.lane.b32.xlu0 %v1415_v28, %s1232_s30  ;;  %570 = vrot.lane.b32.xlu1 %v957_v38, %s1231_s15  ;;  %538 = vst.msk [vmem:[%s1413_s23 + $0x18] sm:$0xf] %vm531_vm0, %v952_v51  ;;  %v953_v61 = vpack.c.bf16 %v432_v52, %v432_v52  ;;  %546 = vst.msk [vmem:[%s1413_s23 + $0x38] sm:$0xf] %vm531_vm0, %v960_v54  ;;  %v961_v62 = vpack.c.bf16 %v464_v55, %v464_v55 }
 0x155   : > { %536 = vst.msk [vmem:[%s1413_s23 + $0x10] sm:$0xf] %vm531_vm0, %v950_v57  ;;  %v951_v63 = vpack.c.bf16 %v424_v58, %v424_v58  ;;  %544 = vst.msk [vmem:[%s1413_s23 + $0x30] sm:$0xf] %vm531_vm0, %v958_v59  ;;  %v959_v0 = vpack.c.bf16 %v456_v60, %v456_v60 }
 0x156   : > { %539 = vst.msk [vmem:[%s1413_s23 + $0x1c] sm:$0xf] %vm531_vm0, %v953_v61  ;;  %547 = vst.msk [vmem:[%s1413_s23 + $0x3c] sm:$0xf] %vm531_vm0, %v961_v62 }
 0x157   : > { %537 = vst.msk [vmem:[%s1413_s23 + $0x14] sm:$0xf] %vm531_vm0, %v951_v63  ;;  %545 = vst.msk [vmem:[%s1413_s23 + $0x34] sm:$0xf] %vm531_vm0, %v959_v0 }
 0x158   : > { %682 = vrot.lane.b32.xlu0 %v948_v27, %s1233_s4  ;;  %619 = vrot.lane.b32.xlu1 %v949_v37, %s1232_s30 }
 0x15c   : > { %698 = vrot.lane.b32.xlu0 %v1415_v28, %s1233_s4  ;;  %635 = vrot.lane.b32.xlu1 %v957_v38, %s1232_s30 }
 0x160   : > { %684 = vrot.lane.b32.xlu1 %v949_v37, %s1233_s4  ;;  %548 = vrot.lane.b32.xlu0 %v1417_v33, %s1231_s15 }
 0x164   : > { %700 = vrot.lane.b32.xlu1 %v957_v38, %s1233_s4  ;;  %564 = vrot.lane.b32.xlu0 %v1419_v34, %s1231_s15 }
 0x168   : > { %566 = vrot.lane.b32.xlu1 %v955_v40, %s1231_s15  ;;  %613 = vrot.lane.b32.xlu0 %v1417_v33, %s1232_s30 }
 0x16c   : > { %615 = vrot.lane.b32.xlu1 %v947_v39, %s1232_s30  ;;  %629 = vrot.lane.b32.xlu0 %v1419_v34, %s1232_s30 }
 0x170   : > { %631 = vrot.lane.b32.xlu1 %v955_v40, %s1232_s30  ;;  %678 = vrot.lane.b32.xlu0 %v1417_v33, %s1233_s4 }
 0x174   : > { %680 = vrot.lane.b32.xlu1 %v947_v39, %s1233_s4  ;;  %694 = vrot.lane.b32.xlu0 %v1419_v34, %s1233_s4 }
 0x178   : > { %696 = vrot.lane.b32.xlu1 %v955_v40, %s1233_s4  ;;  %550 = vrot.lane.b32.xlu0 %v947_v39, %s1231_s15 }
 0x17c   : > { %562 = vrot.lane.b32.xlu1 %v953_v61, %s1231_s15  ;;  %560 = vrot.lane.b32.xlu0 %v952_v51, %s1231_s15 }
 0x180   : > { %578 = vrot.lane.b32.xlu1 %v961_v62, %s1231_s15  ;;  %576 = vrot.lane.b32.xlu0 %v960_v54, %s1231_s15 }
 0x184   : > { %627 = vrot.lane.b32.xlu1 %v953_v61, %s1232_s30  ;;  %625 = vrot.lane.b32.xlu0 %v952_v51, %s1232_s30 }
 0x188   : > { %643 = vrot.lane.b32.xlu1 %v961_v62, %s1232_s30  ;;  %641 = vrot.lane.b32.xlu0 %v960_v54, %s1232_s30 }
 0x18c   : > { %692 = vrot.lane.b32.xlu1 %v953_v61, %s1233_s4  ;;  %690 = vrot.lane.b32.xlu0 %v952_v51, %s1233_s4 }
 0x190   : > { %558 = vrot.lane.b32.xlu1 %v951_v63, %s1231_s15  ;;  %556 = vrot.lane.b32.xlu0 %v950_v57, %s1231_s15 }
 0x194   : > { %574 = vrot.lane.b32.xlu1 %v959_v0, %s1231_s15  ;;  %572 = vrot.lane.b32.xlu0 %v958_v59, %s1231_s15 }
 0x198   : > { %623 = vrot.lane.b32.xlu1 %v951_v63, %s1232_s30  ;;  %621 = vrot.lane.b32.xlu0 %v950_v57, %s1232_s30 }
 0x19c   : > { %639 = vrot.lane.b32.xlu1 %v959_v0, %s1232_s30  ;;  %637 = vrot.lane.b32.xlu0 %v958_v59, %s1232_s30 }
 0x1a0   : > { %688 = vrot.lane.b32.xlu1 %v951_v63, %s1233_s4  ;;  %686 = vrot.lane.b32.xlu0 %v950_v57, %s1233_s4 }
 0x1a4   : > { %704 = vrot.lane.b32.xlu1 %v959_v0, %s1233_s4  ;;  %702 = vrot.lane.b32.xlu0 %v958_v59, %s1233_s4 }
 0x1a8   : > { %708 = vrot.lane.b32.xlu1 %v961_v62, %s1233_s4  ;;  %706 = vrot.lane.b32.xlu0 %v960_v54, %s1233_s4 }
 0x1be   : > { %v569_v1 = vpop.permute.xlu0 %568  ;;  %v553_v2 = vpop.permute.xlu1 %552 }
 0x1bf   : > { %904 = vst.msk [vmem:[%s1413_s23 + $0x68] sm:$0xf] %vm531_vm0, %v569_v1  ;;  %896 = vst.msk [vmem:[%s1413_s23 + $0x48] sm:$0xf] %vm531_vm0, %v553_v2 }
 0x1c2   : > { %v618_v3 = vpop.permute.xlu0 %617  ;;  %v555_v4 = vpop.permute.xlu1 %554 }
 0x1c3   : > { %912 = vst.msk [vmem:[%s1413_s23 + $0x88] sm:$0xf] %vm531_vm0, %v618_v3  ;;  %897 = vst.msk [vmem:[%s1413_s23 + $0x4c] sm:$0xf] %vm531_vm0, %v555_v4 }
 0x1c6   : > { %v634_v5 = vpop.permute.xlu0 %633  ;;  %v571_v6 = vpop.permute.xlu1 %570 }
 0x1c7   : > { %920 = vst.msk [vmem:[%s1413_s23 + $0xa8] sm:$0xf] %vm531_vm0, %v634_v5  ;;  %905 = vst.msk [vmem:[%s1413_s23 + $0x6c] sm:$0xf] %vm531_vm0, %v571_v6 }
 0x1ca   : > { %v683_v7 = vpop.permute.xlu0 %682  ;;  %v620_v8 = vpop.permute.xlu1 %619 }
 0x1cb   : > { %928 = vst.msk [vmem:[%s1413_s23 + $0xc8] sm:$0xf] %vm531_vm0, %v683_v7  ;;  %913 = vst.msk [vmem:[%s1413_s23 + $0x8c] sm:$0xf] %vm531_vm0, %v620_v8 }
 0x1ce   : > { %v699_v9 = vpop.permute.xlu0 %698  ;;  %v636_v10 = vpop.permute.xlu1 %635 }
 0x1cf   : > { %936 = vst.msk [vmem:[%s1413_s23 + $0xe8] sm:$0xf] %vm531_vm0, %v699_v9  ;;  %921 = vst.msk [vmem:[%s1413_s23 + $0xac] sm:$0xf] %vm531_vm0, %v636_v10 }
 0x1d2   : > { %v685_v11 = vpop.permute.xlu1 %684  ;;  %v549_v12 = vpop.permute.xlu0 %548 }
 0x1d3   : > { %929 = vst.msk [vmem:[%s1413_s23 + $0xcc] sm:$0xf] %vm531_vm0, %v685_v11  ;;  %894 = vst.msk [vmem:[%s1413_s23 + $0x40] sm:$0xf] %vm531_vm0, %v549_v12 }
 0x1d6   : > { %v701_v13 = vpop.permute.xlu1 %700  ;;  %v565_v14 = vpop.permute.xlu0 %564 }
 0x1d7   : > { %937 = vst.msk [vmem:[%s1413_s23 + $0xec] sm:$0xf] %vm531_vm0, %v701_v13  ;;  %902 = vst.msk [vmem:[%s1413_s23 + $0x60] sm:$0xf] %vm531_vm0, %v565_v14 }
 0x1da   : > { %v567_v15 = vpop.permute.xlu1 %566  ;;  %v614_v16 = vpop.permute.xlu0 %613 }
 0x1db   : > { %903 = vst.msk [vmem:[%s1413_s23 + $0x64] sm:$0xf] %vm531_vm0, %v567_v15  ;;  %910 = vst.msk [vmem:[%s1413_s23 + $0x80] sm:$0xf] %vm531_vm0, %v614_v16 }
 0x1de   : > { %v616_v17 = vpop.permute.xlu1 %615  ;;  %v630_v18 = vpop.permute.xlu0 %629 }
 0x1df   : > { %911 = vst.msk [vmem:[%s1413_s23 + $0x84] sm:$0xf] %vm531_vm0, %v616_v17  ;;  %918 = vst.msk [vmem:[%s1413_s23 + $0xa0] sm:$0xf] %vm531_vm0, %v630_v18 }
 0x1e2   : > { %v632_v19 = vpop.permute.xlu1 %631  ;;  %v679_v20 = vpop.permute.xlu0 %678 }
 0x1e3   : > { %919 = vst.msk [vmem:[%s1413_s23 + $0xa4] sm:$0xf] %vm531_vm0, %v632_v19  ;;  %926 = vst.msk [vmem:[%s1413_s23 + $0xc0] sm:$0xf] %vm531_vm0, %v679_v20 }
 0x1e6   : > { %v681_v21 = vpop.permute.xlu1 %680  ;;  %v695_v22 = vpop.permute.xlu0 %694 }
 0x1e7   : > { %927 = vst.msk [vmem:[%s1413_s23 + $0xc4] sm:$0xf] %vm531_vm0, %v681_v21  ;;  %934 = vst.msk [vmem:[%s1413_s23 + $0xe0] sm:$0xf] %vm531_vm0, %v695_v22 }
 0x1ea   : > { %v697_v23 = vpop.permute.xlu1 %696  ;;  %v551_v24 = vpop.permute.xlu0 %550 }
 0x1eb   : > { %935 = vst.msk [vmem:[%s1413_s23 + $0xe4] sm:$0xf] %vm531_vm0, %v697_v23  ;;  %895 = vst.msk [vmem:[%s1413_s23 + $0x44] sm:$0xf] %vm531_vm0, %v551_v24 }
 0x1ee   : > { %v563_v25 = vpop.permute.xlu1 %562  ;;  %v561_v26 = vpop.permute.xlu0 %560 }
 0x1ef   : > { %901 = vst.msk [vmem:[%s1413_s23 + $0x5c] sm:$0xf] %vm531_vm0, %v563_v25  ;;  %900 = vst.msk [vmem:[%s1413_s23 + $0x58] sm:$0xf] %vm531_vm0, %v561_v26 }
 0x1f2   : > { %v579_v27 = vpop.permute.xlu1 %578  ;;  %v577_v28 = vpop.permute.xlu0 %576 }
 0x1f3   : > { %909 = vst.msk [vmem:[%s1413_s23 + $0x7c] sm:$0xf] %vm531_vm0, %v579_v27  ;;  %908 = vst.msk [vmem:[%s1413_s23 + $0x78] sm:$0xf] %vm531_vm0, %v577_v28 }
 0x1f6   : > { %v628_v29 = vpop.permute.xlu1 %627  ;;  %v626_v30 = vpop.permute.xlu0 %625 }
 0x1f7   : > { %917 = vst.msk [vmem:[%s1413_s23 + $0x9c] sm:$0xf] %vm531_vm0, %v628_v29  ;;  %916 = vst.msk [vmem:[%s1413_s23 + $0x98] sm:$0xf] %vm531_vm0, %v626_v30 }
 0x1fa   : > { %v644_v31 = vpop.permute.xlu1 %643  ;;  %v642_v32 = vpop.permute.xlu0 %641 }
 0x1fb   : > { %925 = vst.msk [vmem:[%s1413_s23 + $0xbc] sm:$0xf] %vm531_vm0, %v644_v31  ;;  %924 = vst.msk [vmem:[%s1413_s23 + $0xb8] sm:$0xf] %vm531_vm0, %v642_v32 }
 0x1fe   : > { %v693_v33 = vpop.permute.xlu1 %692  ;;  %v691_v34 = vpop.permute.xlu0 %690 }
 0x1ff   : > { %933 = vst.msk [vmem:[%s1413_s23 + $0xdc] sm:$0xf] %vm531_vm0, %v693_v33  ;;  %932 = vst.msk [vmem:[%s1413_s23 + $0xd8] sm:$0xf] %vm531_vm0, %v691_v34 }
 0x202   : > { %v559_v35 = vpop.permute.xlu1 %558  ;;  %v557_v36 = vpop.permute.xlu0 %556 }
 0x203   : > { %899 = vst.msk [vmem:[%s1413_s23 + $0x54] sm:$0xf] %vm531_vm0, %v559_v35  ;;  %898 = vst.msk [vmem:[%s1413_s23 + $0x50] sm:$0xf] %vm531_vm0, %v557_v36 }
 0x206   : > { %v575_v37 = vpop.permute.xlu1 %574  ;;  %v573_v38 = vpop.permute.xlu0 %572 }
 0x207   : > { %907 = vst.msk [vmem:[%s1413_s23 + $0x74] sm:$0xf] %vm531_vm0, %v575_v37  ;;  %906 = vst.msk [vmem:[%s1413_s23 + $0x70] sm:$0xf] %vm531_vm0, %v573_v38 }
 0x20a   : > { %v624_v39 = vpop.permute.xlu1 %623  ;;  %v622_v40 = vpop.permute.xlu0 %621 }
 0x20b   : > { %915 = vst.msk [vmem:[%s1413_s23 + $0x94] sm:$0xf] %vm531_vm0, %v624_v39  ;;  %914 = vst.msk [vmem:[%s1413_s23 + $0x90] sm:$0xf] %vm531_vm0, %v622_v40 }
 0x20e   : > { %v640_v41 = vpop.permute.xlu1 %639  ;;  %v638_v42 = vpop.permute.xlu0 %637 }
 0x20f   : > { %923 = vst.msk [vmem:[%s1413_s23 + $0xb4] sm:$0xf] %vm531_vm0, %v640_v41  ;;  %922 = vst.msk [vmem:[%s1413_s23 + $0xb0] sm:$0xf] %vm531_vm0, %v638_v42 }
 0x212   : > { %v689_v43 = vpop.permute.xlu1 %688  ;;  %v687_v44 = vpop.permute.xlu0 %686 }
 0x213   : > { %931 = vst.msk [vmem:[%s1413_s23 + $0xd4] sm:$0xf] %vm531_vm0, %v689_v43  ;;  %930 = vst.msk [vmem:[%s1413_s23 + $0xd0] sm:$0xf] %vm531_vm0, %v687_v44 }
 0x216   : > { %v705_v45 = vpop.permute.xlu1 %704  ;;  %v703_v46 = vpop.permute.xlu0 %702 }
 0x217   : > { %939 = vst.msk [vmem:[%s1413_s23 + $0xf4] sm:$0xf] %vm531_vm0, %v705_v45  ;;  %938 = vst.msk [vmem:[%s1413_s23 + $0xf0] sm:$0xf] %vm531_vm0, %v703_v46 }
 0x21a   : > { %v709_v47 = vpop.permute.xlu1 %708  ;;  %v707_v48 = vpop.permute.xlu0 %706 }
 0x21b   : > { %941 = vst.msk [vmem:[%s1413_s23 + $0xfc] sm:$0xf] %vm531_vm0, %v709_v47  ;;  %940 = vst.msk [vmem:[%s1413_s23 + $0xf8] sm:$0xf] %vm531_vm0, %v707_v48 }
 0x21c PF: > { %s17_s17 = sadd.s32 1, %s1225_s17   ;;  %s1643_s12 = smov %s1209_s13 }
 0x21d   : > { %p14_p1 = scmp.ge.s32.totalorder %s17_s17, 4   ;;  %s1644_s13 = smov %s1213_s14 }
 0x21e   : > { %s1645_s14 = smov %s1340_s26  ;;  %s1646_s15 = smov %s1221_s16 }
 0x21f   : > { %s1647_s16 = smov %s1649_s25  ;;  %16 = sbr.rel (!%p14_p1) target bundleno = 5 (0x5), region = 79 }
 0x226   :  { %773 = vsyncpa [#allocation3], 1 }
 0x227   :  { %775 = vsyncpa [#allocation3 + $0x1], 1 }
 0x228   :  { %776 = vsyncpa [#allocation5], 1 }

</bundles_post_ra>
